<compile_context>
chip_gen: v7x
topology: tpu7x:2x2x1
jax: 0.10.0
libtpu: 0.0.40
codegen_flags: <defaults>
</compile_context>

<pallas_src>
import jax
import jax.numpy as jnp
import numpy as np
from jax.experimental import pallas as pl
from jax.experimental.pallas import tpu as pltpu


_VMEM = pl.BlockSpec(memory_space=pltpu.MemorySpace.VMEM)
_SMEM = pl.BlockSpec(memory_space=pltpu.MemorySpace.SMEM)


# ----------------------------- fused Pallas kernel ---------------------------

def ddea_fused_kernel(idx_ref, xy_ref, emb_ref,
                      wenc1_ref, benc1_ref, wenc2_ref, benc2_ref,
                      wdec1_ref, bdec1_ref, wdec2_ref, bdec2_ref,
                      preds_x_ref, preds_y_ref, preds_x2y_ref, preds_y2x_ref,
                      feat_x_ref, feat_y_ref, loss_ref):
    f32 = jnp.float32
    B = xy_ref.shape[0]
    U = emb_ref.shape[0]
    E = feat_x_ref.shape[1]
    NM = preds_x_ref.shape[1]
    NB = preds_y_ref.shape[1]

    def linear(x, w_ref, b_ref):
        # f32 operands on the MXU, f32 accumulation.
        return jnp.dot(x, w_ref[...], preferred_element_type=f32) + b_ref[...]

    def mlp2(x, w1_ref, b1_ref, w2_ref, b2_ref):
        # Linear -> ReLU -> Linear
        return linear(jnp.maximum(linear(x, w1_ref, b1_ref), 0.0), w2_ref, b2_ref)

    # --- Fused encoders (dropout == identity at inference) -------------------
    # xy = [batch_user_x | batch_user_y]  -> h_enc = [h_user_x | h_user_y]
    h_enc = mlp2(xy_ref[...], wenc1_ref, benc1_ref, wenc2_ref, benc2_ref)  # (B, 2E)

    # --- Stacked one-hot embedding gather: one (2B,U)@(U,E) matmul ------------
    # idx rows 0:B = batch_user_1, rows B:2B = batch_user_2.
    # TODO(synk): nn.Embedding would error on an out-of-range index; the one-hot
    #             gather silently yields a zero row instead.
    iota_u = jax.lax.broadcasted_iota(jnp.int32, (2 * B, U), 1)
    oh = (iota_u == idx_ref[...]).astype(f32)                               # (2B, U)
    h_user_12 = jnp.dot(oh, emb_ref[...], preferred_element_type=f32)       # (2B, E)

    # --- feature / z (row-stacked layout: rows 0:B = "x", rows B:2B = "y") ---
    h_enc_stacked = jnp.concatenate([h_enc[:, :E], h_enc[:, E:]], axis=0)   # (2B, E)
    feature_stacked = h_enc_stacked + h_user_12                             # (2B, E)
    z_stacked = jnp.maximum(feature_stacked, 0.0)                           # (2B, E)

    # --- Fused decoders: ONE MLP over (2B, E) -> (2B, NM+NB) ------------------
    # cols 0:NM = decoder_x output, cols NM: = decoder_y output.
    dec_out = mlp2(z_stacked, wdec1_ref, bdec1_ref, wdec2_ref, bdec2_ref)   # (2B, NM+NB)
    # rows 0:B came from z_x, rows B:2B from z_y:
    #   preds_x   = dec_out[:B, :NM]   preds_x2y = dec_out[:B, NM:]
    #   preds_y2x = dec_out[B:, :NM]   preds_y   = dec_out[B:, NM:]

    # --- Reconstruction pass through the SAME fused encoder -------------------
    # rec_in = [preds_y2x | preds_x2y]: cols < NM from bottom rows, cols >= NM
    # from top rows -> pure VPU select, no lane shuffles.
    col_iota = jax.lax.broadcasted_iota(jnp.int32, (B, NM + NB), 1)
    rec_in = jnp.where(col_iota < NM, dec_out[B:], dec_out[:B])             # (B, NM+NB)
    rec = mlp2(rec_in, wenc1_ref, benc1_ref, wenc2_ref, benc2_ref)          # (B, 2E)
    # rec cols 0:E = encoder_x(preds_y2x), cols E:2E = encoder_y(preds_x2y)
    feature_y_r = rec[:, :E] + h_user_12[B:]                                # (B, E)
    feature_x_r = rec[:, E:] + h_user_12[:B]                                # (B, E)

    # --- Dual losses (Frobenius norms, f32) -----------------------------------
    dx = z_stacked[:B] - feature_x_r
    dy = z_stacked[B:] - feature_y_r
    loss_ref[0, 0] = jnp.sqrt(jnp.sum(dx * dx))
    loss_ref[0, 1] = jnp.sqrt(jnp.sum(dy * dy))

    # --- Separate, lane-0-aligned outputs -------------------------------------
    preds_x_ref[...] = dec_out[:B, :NM]
    preds_x2y_ref[...] = dec_out[:B, NM:]
    preds_y2x_ref[...] = dec_out[B:, :NM]
    preds_y_ref[...] = dec_out[B:, NM:]
    feat_x_ref[...] = feature_stacked[:B]
    feat_y_ref[...] = feature_stacked[B:]


# ------------------------------ parameters -----------------------------------

def init_params(key, num_user, num_movie, num_book, embed):
    ks = jax.random.split(key, 9)

    def lin(k, fan_in, fan_out):
        kw, kb = jax.random.split(k)
        w = jax.random.normal(kw, (fan_in, fan_out), jnp.float32) * 0.05
        b = jax.random.normal(kb, (1, fan_out), jnp.float32) * 0.01
        return w, b

    # nn.Embedding weight ~ N(0, 0.01) as in the module __init__
    emb = jax.random.normal(ks[0], (num_user, embed), jnp.float32) * 0.01

    enc_x = lin(ks[1], num_movie, embed) + lin(ks[2], embed, embed)
    dec_x = lin(ks[3], embed, embed) + lin(ks[4], embed, num_movie)
    enc_y = lin(ks[5], num_book, embed) + lin(ks[6], embed, embed)
    dec_y = lin(ks[7], embed, embed) + lin(ks[8], embed, num_book)

    return dict(emb=emb, enc_x=enc_x, dec_x=dec_x, enc_y=enc_y, dec_y=dec_y)


def _blockdiag(a, b):
    r1, c1 = a.shape
    r2, c2 = b.shape
    top = jnp.concatenate([a, jnp.zeros((r1, c2), a.dtype)], axis=1)
    bot = jnp.concatenate([jnp.zeros((r2, c1), b.dtype), b], axis=1)
    return jnp.concatenate([top, bot], axis=0)


# ------------------------------ forward ---------------------------------------

def ddea_forward(params, batch_user_1, batch_user_2, batch_user_x, batch_user_y):
    B, NM = batch_user_x.shape
    NB = batch_user_y.shape[1]
    E = params["emb"].shape[1]

    wex1, bex1, wex2, bex2 = params["enc_x"]
    wey1, bey1, wey2, bey2 = params["enc_y"]
    wdx1, bdx1, wdx2, bdx2 = params["dec_x"]
    wdy1, bdy1, wdy2, bdy2 = params["dec_y"]

    # Fused encoder weights (block-diagonal): input [x | y] -> [enc_x | enc_y].
    wenc1 = _blockdiag(wex1, wey1)                       # (NM+NB, 2E)
    benc1 = jnp.concatenate([bex1, bey1], axis=-1)       # (1, 2E)
    wenc2 = _blockdiag(wex2, wey2)                       # (2E, 2E)
    benc2 = jnp.concatenate([bex2, bey2], axis=-1)       # (1, 2E)

    # Fused decoder weights: one MLP produces [decoder_x | decoder_y] columns.
    wdec1 = jnp.concatenate([wdx1, wdy1], axis=1)        # (E, 2E)
    bdec1 = jnp.concatenate([bdx1, bdy1], axis=-1)       # (1, 2E)
    wdec2 = _blockdiag(wdx2, wdy2)                       # (2E, NM+NB)
    bdec2 = jnp.concatenate([bdx2, bdy2], axis=-1)       # (1, NM+NB)

    # Combined inputs: row-stacked indices, lane-concatenated x/y.
    idx = jnp.concatenate([batch_user_1.astype(jnp.int32),
                           batch_user_2.astype(jnp.int32)], axis=0).reshape(2 * B, 1)
    xy = jnp.concatenate([batch_user_x, batch_user_y], axis=-1)   # (B, NM+NB)

    outs = pl.pallas_call(
        ddea_fused_kernel,
        out_shape=(jax.ShapeDtypeStruct((B, NM), jnp.float32),    # preds_x
                   jax.ShapeDtypeStruct((B, NB), jnp.float32),    # preds_y
                   jax.ShapeDtypeStruct((B, NB), jnp.float32),    # preds_x2y
                   jax.ShapeDtypeStruct((B, NM), jnp.float32),    # preds_y2x
                   jax.ShapeDtypeStruct((B, E), jnp.float32),     # feature_x
                   jax.ShapeDtypeStruct((B, E), jnp.float32),     # feature_y
                   jax.ShapeDtypeStruct((1, 2), jnp.float32)),    # dual losses
        in_specs=[_VMEM] * 11,
        out_specs=(_VMEM, _VMEM, _VMEM, _VMEM, _VMEM, _VMEM, _SMEM),
    )(idx, xy, params["emb"],
      wenc1, benc1, wenc2, benc2,
      wdec1, bdec1, wdec2, bdec2)

    preds_x, preds_y, preds_x2y, preds_y2x, feature_x, feature_y, losses = outs
    return (preds_x, preds_y, preds_x2y, preds_y2x, feature_x, feature_y,
            losses[0, 0], losses[0, 1])


# ------------------------------ pure-JAX reference -----------------------------

def ddea_reference(params, b1, b2, x, y):
    wex1, bex1, wex2, bex2 = params["enc_x"]
    wey1, bey1, wey2, bey2 = params["enc_y"]
    wdx1, bdx1, wdx2, bdx2 = params["dec_x"]
    wdy1, bdy1, wdy2, bdy2 = params["dec_y"]
    emb = params["emb"]

    def mlp(v, w1, b1_, w2, b2_):
        return jnp.maximum(v @ w1 + b1_, 0.0) @ w2 + b2_

    h_user_x = mlp(x, wex1, bex1, wex2, bex2)
    h_user_y = mlp(y, wey1, bey1, wey2, bey2)
    h_user_1 = emb[b1]
    h_user_2 = emb[b2]
    feature_x = h_user_x + h_user_1
    feature_y = h_user_y + h_user_2
    z_x = jnp.maximum(feature_x, 0.0)
    z_y = jnp.maximum(feature_y, 0.0)
    preds_x = mlp(z_x, wdx1, bdx1, wdx2, bdx2)
    preds_y = mlp(z_y, wdy1, bdy1, wdy2, bdy2)
    preds_x2y = mlp(z_x, wdy1, bdy1, wdy2, bdy2)
    preds_y2x = mlp(z_y, wdx1, bdx1, wdx2, bdx2)
    feature_x_r = mlp(preds_x2y, wey1, bey1, wey2, bey2) + h_user_1
    feature_y_r = mlp(preds_y2x, wex1, bex1, wex2, bex2) + h_user_2
    lx = jnp.sqrt(jnp.sum((z_x - feature_x_r) ** 2))
    ly = jnp.sqrt(jnp.sum((z_y - feature_y_r) ** 2))
    return (preds_x, preds_y, preds_x2y, preds_y2x, feature_x, feature_y, lx, ly)


# ------------------------------ main -------------------------------------------

if __name__ == "__main__":
    NUM_USER, NUM_MOVIE, NUM_BOOK, EMBED = 16, 48, 40, 32
    B = 8

    key = jax.random.PRNGKey(0)
    kp, k1, k2, kx, ky = jax.random.split(key, 5)

    params = init_params(kp, NUM_USER, NUM_MOVIE, NUM_BOOK, EMBED)

    batch_user_1 = jax.random.randint(k1, (B,), 0, NUM_USER, dtype=jnp.int32)
    batch_user_2 = jax.random.randint(k2, (B,), 0, NUM_USER, dtype=jnp.int32)
    batch_user_x = jax.random.bernoulli(kx, 0.2, (B, NUM_MOVIE)).astype(jnp.float32)
    batch_user_y = jax.random.bernoulli(ky, 0.2, (B, NUM_BOOK)).astype(jnp.float32)

    fwd = jax.jit(ddea_forward)
    outs = fwd(params, batch_user_1, batch_user_2, batch_user_x, batch_user_y)
    outs = jax.block_until_ready(outs)

    # shape sanity
    assert outs[0].shape == (B, NUM_MOVIE)
    assert outs[1].shape == (B, NUM_BOOK)
    assert outs[2].shape == (B, NUM_BOOK)
    assert outs[3].shape == (B, NUM_MOVIE)
    assert outs[4].shape == (B, EMBED)
    assert outs[5].shape == (B, EMBED)
    assert outs[6].shape == () and outs[7].shape == ()

    # numerical sanity vs pure-JAX reference (loose tolerance: MXU default
    # precision for f32 matmuls may differ slightly from XLA's).
    ref = ddea_reference(params, batch_user_1, batch_user_2,
                         batch_user_x, batch_user_y)
    for got, want in zip(outs, ref):
        np.testing.assert_allclose(np.asarray(got), np.asarray(want),
                                   rtol=5e-2, atol=5e-2)

    print("KERNEL_OK")
</pallas_src>

<mosaic_0001>
module attributes {stable_mosaic.version = 11 : i64} {
  func.func @ddea_fused_kernel(%arg0: memref<16x1xi32, #tpu.memory_space<vmem>>, %arg1: memref<8x88xf32, #tpu.memory_space<vmem>>, %arg2: memref<16x32xf32, #tpu.memory_space<vmem>>, %arg3: memref<88x64xf32, #tpu.memory_space<vmem>>, %arg4: memref<1x64xf32, #tpu.memory_space<vmem>>, %arg5: memref<64x64xf32, #tpu.memory_space<vmem>>, %arg6: memref<1x64xf32, #tpu.memory_space<vmem>>, %arg7: memref<32x64xf32, #tpu.memory_space<vmem>>, %arg8: memref<1x64xf32, #tpu.memory_space<vmem>>, %arg9: memref<64x88xf32, #tpu.memory_space<vmem>>, %arg10: memref<1x88xf32, #tpu.memory_space<vmem>>, %arg11: memref<8x48xf32, #tpu.memory_space<vmem>>, %arg12: memref<8x40xf32, #tpu.memory_space<vmem>>, %arg13: memref<8x40xf32, #tpu.memory_space<vmem>>, %arg14: memref<8x48xf32, #tpu.memory_space<vmem>>, %arg15: memref<8x32xf32, #tpu.memory_space<vmem>>, %arg16: memref<8x32xf32, #tpu.memory_space<vmem>>, %arg17: memref<1x2xf32, #tpu.memory_space<smem>>) attributes {dimension_semantics = [], scalar_prefetch = 0 : i64, scratch_operands = 0 : i64, tpu.core_type = #tpu.core_type<tc>} {
    %c0 = arith.constant 0 : index
    %c0_0 = arith.constant 0 : index
    %0 = vector.load %arg1[%c0, %c0_0] : memref<8x88xf32, #tpu.memory_space<vmem>>, vector<8x88xf32>
    %c0_1 = arith.constant 0 : index
    %c0_2 = arith.constant 0 : index
    %1 = vector.load %arg3[%c0_1, %c0_2] : memref<88x64xf32, #tpu.memory_space<vmem>>, vector<88x64xf32>
    %cst = arith.constant dense<0.000000e+00> : vector<8x64xf32>
    %2 = tpu.matmul %0, %1, %cst {dimension_numbers = #tpu.dot_dimension_numbers<[1], [0], [0], [1], [0, 0, 1, 1], [], []>} : vector<8x88xf32>, vector<88x64xf32>, vector<8x64xf32> -> vector<8x64xf32>
    %c0_3 = arith.constant 0 : index
    %c0_4 = arith.constant 0 : index
    %3 = vector.load %arg4[%c0_3, %c0_4] : memref<1x64xf32, #tpu.memory_space<vmem>>, vector<1x64xf32>
    %4 = vector.broadcast %3 : vector<1x64xf32> to vector<8x64xf32>
    %5 = arith.addf %2, %4 : vector<8x64xf32>
    %cst_5 = arith.constant 0.000000e+00 : f32
    %6 = vector.broadcast %cst_5 : f32 to vector<8x64xf32>
    %7 = arith.maximumf %5, %6 : vector<8x64xf32>
    %c0_6 = arith.constant 0 : index
    %c0_7 = arith.constant 0 : index
    %8 = vector.load %arg5[%c0_6, %c0_7] : memref<64x64xf32, #tpu.memory_space<vmem>>, vector<64x64xf32>
    %cst_8 = arith.constant dense<0.000000e+00> : vector<8x64xf32>
    %9 = tpu.matmul %7, %8, %cst_8 {dimension_numbers = #tpu.dot_dimension_numbers<[1], [0], [0], [1], [0, 0, 1, 1], [], []>} : vector<8x64xf32>, vector<64x64xf32>, vector<8x64xf32> -> vector<8x64xf32>
    %c0_9 = arith.constant 0 : index
    %c0_10 = arith.constant 0 : index
    %10 = vector.load %arg6[%c0_9, %c0_10] : memref<1x64xf32, #tpu.memory_space<vmem>>, vector<1x64xf32>
    %11 = vector.broadcast %10 : vector<1x64xf32> to vector<8x64xf32>
    %12 = arith.addf %9, %11 : vector<8x64xf32>
    %13 = tpu.iota {dimensions = array<i32: 1>} : vector<16x16xi32>
    %c0_11 = arith.constant 0 : index
    %c0_12 = arith.constant 0 : index
    %14 = vector.load %arg0[%c0_11, %c0_12] : memref<16x1xi32, #tpu.memory_space<vmem>>, vector<16x1xi32>
    %15 = vector.broadcast %14 : vector<16x1xi32> to vector<16x16xi32>
    %16 = arith.cmpi eq, %13, %15 : vector<16x16xi32>
    %17 = arith.extui %16 : vector<16x16xi1> to vector<16x16xi32>
    %18 = arith.sitofp %17 : vector<16x16xi32> to vector<16x16xf32>
    %c0_13 = arith.constant 0 : index
    %c0_14 = arith.constant 0 : index
    %19 = vector.load %arg2[%c0_13, %c0_14] : memref<16x32xf32, #tpu.memory_space<vmem>>, vector<16x32xf32>
    %cst_15 = arith.constant dense<0.000000e+00> : vector<16x32xf32>
    %20 = tpu.matmul %18, %19, %cst_15 {dimension_numbers = #tpu.dot_dimension_numbers<[1], [0], [0], [1], [0, 0, 1, 1], [], []>} : vector<16x16xf32>, vector<16x32xf32>, vector<16x32xf32> -> vector<16x32xf32>
    %21 = vector.extract_strided_slice %12 {offsets = [0, 0], sizes = [8, 32], strides = [1, 1]} : vector<8x64xf32> to vector<8x32xf32>
    %22 = vector.extract_strided_slice %12 {offsets = [0, 32], sizes = [8, 32], strides = [1, 1]} : vector<8x64xf32> to vector<8x32xf32>
    %23 = tpu.concatenate %21, %22 in 0 : vector<8x32xf32>, vector<8x32xf32> -> vector<16x32xf32>
    %24 = arith.addf %23, %20 : vector<16x32xf32>
    %cst_16 = arith.constant 0.000000e+00 : f32
    %25 = vector.broadcast %cst_16 : f32 to vector<16x32xf32>
    %26 = arith.maximumf %24, %25 : vector<16x32xf32>
    %c0_17 = arith.constant 0 : index
    %c0_18 = arith.constant 0 : index
    %27 = vector.load %arg7[%c0_17, %c0_18] : memref<32x64xf32, #tpu.memory_space<vmem>>, vector<32x64xf32>
    %cst_19 = arith.constant dense<0.000000e+00> : vector<16x64xf32>
    %28 = tpu.matmul %26, %27, %cst_19 {dimension_numbers = #tpu.dot_dimension_numbers<[1], [0], [0], [1], [0, 0, 1, 1], [], []>} : vector<16x32xf32>, vector<32x64xf32>, vector<16x64xf32> -> vector<16x64xf32>
    %c0_20 = arith.constant 0 : index
    %c0_21 = arith.constant 0 : index
    %29 = vector.load %arg8[%c0_20, %c0_21] : memref<1x64xf32, #tpu.memory_space<vmem>>, vector<1x64xf32>
    %30 = vector.broadcast %29 : vector<1x64xf32> to vector<16x64xf32>
    %31 = arith.addf %28, %30 : vector<16x64xf32>
    %cst_22 = arith.constant 0.000000e+00 : f32
    %32 = vector.broadcast %cst_22 : f32 to vector<16x64xf32>
    %33 = arith.maximumf %31, %32 : vector<16x64xf32>
    %c0_23 = arith.constant 0 : index
    %c0_24 = arith.constant 0 : index
    %34 = vector.load %arg9[%c0_23, %c0_24] : memref<64x88xf32, #tpu.memory_space<vmem>>, vector<64x88xf32>
    %cst_25 = arith.constant dense<0.000000e+00> : vector<16x88xf32>
    %35 = tpu.matmul %33, %34, %cst_25 {dimension_numbers = #tpu.dot_dimension_numbers<[1], [0], [0], [1], [0, 0, 1, 1], [], []>} : vector<16x64xf32>, vector<64x88xf32>, vector<16x88xf32> -> vector<16x88xf32>
    %c0_26 = arith.constant 0 : index
    %c0_27 = arith.constant 0 : index
    %36 = vector.load %arg10[%c0_26, %c0_27] : memref<1x88xf32, #tpu.memory_space<vmem>>, vector<1x88xf32>
    %37 = vector.broadcast %36 : vector<1x88xf32> to vector<16x88xf32>
    %38 = arith.addf %35, %37 : vector<16x88xf32>
    %39 = tpu.iota {dimensions = array<i32: 1>} : vector<8x88xi32>
    %c48_i32 = arith.constant 48 : i32
    %40 = vector.broadcast %c48_i32 : i32 to vector<8x88xi32>
    %41 = arith.cmpi slt, %39, %40 : vector<8x88xi32>
    %42 = vector.extract_strided_slice %38 {offsets = [8, 0], sizes = [8, 88], strides = [1, 1]} : vector<16x88xf32> to vector<8x88xf32>
    %43 = vector.extract_strided_slice %38 {offsets = [0, 0], sizes = [8, 88], strides = [1, 1]} : vector<16x88xf32> to vector<8x88xf32>
    %44 = arith.select %41, %42, %43 : vector<8x88xi1>, vector<8x88xf32>
    %c0_28 = arith.constant 0 : index
    %c0_29 = arith.constant 0 : index
    %45 = vector.load %arg3[%c0_28, %c0_29] : memref<88x64xf32, #tpu.memory_space<vmem>>, vector<88x64xf32>
    %cst_30 = arith.constant dense<0.000000e+00> : vector<8x64xf32>
    %46 = tpu.matmul %44, %45, %cst_30 {dimension_numbers = #tpu.dot_dimension_numbers<[1], [0], [0], [1], [0, 0, 1, 1], [], []>} : vector<8x88xf32>, vector<88x64xf32>, vector<8x64xf32> -> vector<8x64xf32>
    %c0_31 = arith.constant 0 : index
    %c0_32 = arith.constant 0 : index
    %47 = vector.load %arg4[%c0_31, %c0_32] : memref<1x64xf32, #tpu.memory_space<vmem>>, vector<1x64xf32>
    %48 = vector.broadcast %47 : vector<1x64xf32> to vector<8x64xf32>
    %49 = arith.addf %46, %48 : vector<8x64xf32>
    %cst_33 = arith.constant 0.000000e+00 : f32
    %50 = vector.broadcast %cst_33 : f32 to vector<8x64xf32>
    %51 = arith.maximumf %49, %50 : vector<8x64xf32>
    %c0_34 = arith.constant 0 : index
    %c0_35 = arith.constant 0 : index
    %52 = vector.load %arg5[%c0_34, %c0_35] : memref<64x64xf32, #tpu.memory_space<vmem>>, vector<64x64xf32>
    %cst_36 = arith.constant dense<0.000000e+00> : vector<8x64xf32>
    %53 = tpu.matmul %51, %52, %cst_36 {dimension_numbers = #tpu.dot_dimension_numbers<[1], [0], [0], [1], [0, 0, 1, 1], [], []>} : vector<8x64xf32>, vector<64x64xf32>, vector<8x64xf32> -> vector<8x64xf32>
    %c0_37 = arith.constant 0 : index
    %c0_38 = arith.constant 0 : index
    %54 = vector.load %arg6[%c0_37, %c0_38] : memref<1x64xf32, #tpu.memory_space<vmem>>, vector<1x64xf32>
    %55 = vector.broadcast %54 : vector<1x64xf32> to vector<8x64xf32>
    %56 = arith.addf %53, %55 : vector<8x64xf32>
    %57 = vector.extract_strided_slice %56 {offsets = [0, 0], sizes = [8, 32], strides = [1, 1]} : vector<8x64xf32> to vector<8x32xf32>
    %58 = vector.extract_strided_slice %20 {offsets = [8, 0], sizes = [8, 32], strides = [1, 1]} : vector<16x32xf32> to vector<8x32xf32>
    %59 = arith.addf %57, %58 : vector<8x32xf32>
    %60 = vector.extract_strided_slice %56 {offsets = [0, 32], sizes = [8, 32], strides = [1, 1]} : vector<8x64xf32> to vector<8x32xf32>
    %61 = vector.extract_strided_slice %20 {offsets = [0, 0], sizes = [8, 32], strides = [1, 1]} : vector<16x32xf32> to vector<8x32xf32>
    %62 = arith.addf %60, %61 : vector<8x32xf32>
    %63 = vector.extract_strided_slice %26 {offsets = [0, 0], sizes = [8, 32], strides = [1, 1]} : vector<16x32xf32> to vector<8x32xf32>
    %64 = arith.subf %63, %62 : vector<8x32xf32>
    %65 = vector.extract_strided_slice %26 {offsets = [8, 0], sizes = [8, 32], strides = [1, 1]} : vector<16x32xf32> to vector<8x32xf32>
    %66 = arith.subf %65, %59 : vector<8x32xf32>
    %67 = arith.mulf %64, %64 : vector<8x32xf32>
    %68 = vector.shape_cast %67 : vector<8x32xf32> to vector<1x8x32xf32>
    %cst_39 = arith.constant dense<0.000000e+00> : vector<1xf32>
    %69 = vector.multi_reduction <add>, %68, %cst_39 [1, 2] : vector<1x8x32xf32> to vector<1xf32>
    %70 = vector.shape_cast %69 : vector<1xf32> to vector<1x1x1xf32>
    %71 = vector.extract %70[0, 0, 0] : f32 from vector<1x1x1xf32>
    %72 = math.sqrt %71 : f32
    %c0_40 = arith.constant 0 : index
    %c0_41 = arith.constant 0 : index
    %73 = memref.load %arg17[%c0_40, %c0_41] : memref<1x2xf32, #tpu.memory_space<smem>>
    memref.store %72, %arg17[%c0_40, %c0_41] : memref<1x2xf32, #tpu.memory_space<smem>>
    %74 = arith.mulf %66, %66 : vector<8x32xf32>
    %75 = vector.shape_cast %74 : vector<8x32xf32> to vector<1x8x32xf32>
    %cst_42 = arith.constant dense<0.000000e+00> : vector<1xf32>
    %76 = vector.multi_reduction <add>, %75, %cst_42 [1, 2] : vector<1x8x32xf32> to vector<1xf32>
    %77 = vector.shape_cast %76 : vector<1xf32> to vector<1x1x1xf32>
    %78 = vector.extract %77[0, 0, 0] : f32 from vector<1x1x1xf32>
    %79 = math.sqrt %78 : f32
    %c0_43 = arith.constant 0 : index
    %c1 = arith.constant 1 : index
    %80 = memref.load %arg17[%c0_43, %c1] : memref<1x2xf32, #tpu.memory_space<smem>>
    memref.store %79, %arg17[%c0_43, %c1] : memref<1x2xf32, #tpu.memory_space<smem>>
    %81 = vector.extract_strided_slice %38 {offsets = [0, 0], sizes = [8, 48], strides = [1, 1]} : vector<16x88xf32> to vector<8x48xf32>
    %c0_44 = arith.constant 0 : index
    %c0_45 = arith.constant 0 : index
    %82 = vector.load %arg11[%c0_44, %c0_45] : memref<8x48xf32, #tpu.memory_space<vmem>>, vector<8x48xf32>
    tpu.vector_store %arg11[%c0_44, %c0_45], %81 {strides = array<i32>} : memref<8x48xf32, #tpu.memory_space<vmem>>, vector<8x48xf32>,
    %83 = vector.extract_strided_slice %38 {offsets = [0, 48], sizes = [8, 40], strides = [1, 1]} : vector<16x88xf32> to vector<8x40xf32>
    %c0_46 = arith.constant 0 : index
    %c0_47 = arith.constant 0 : index
    %84 = vector.load %arg13[%c0_46, %c0_47] : memref<8x40xf32, #tpu.memory_space<vmem>>, vector<8x40xf32>
    tpu.vector_store %arg13[%c0_46, %c0_47], %83 {strides = array<i32>} : memref<8x40xf32, #tpu.memory_space<vmem>>, vector<8x40xf32>,
    %85 = vector.extract_strided_slice %38 {offsets = [8, 0], sizes = [8, 48], strides = [1, 1]} : vector<16x88xf32> to vector<8x48xf32>
    %c0_48 = arith.constant 0 : index
    %c0_49 = arith.constant 0 : index
    %86 = vector.load %arg14[%c0_48, %c0_49] : memref<8x48xf32, #tpu.memory_space<vmem>>, vector<8x48xf32>
    tpu.vector_store %arg14[%c0_48, %c0_49], %85 {strides = array<i32>} : memref<8x48xf32, #tpu.memory_space<vmem>>, vector<8x48xf32>,
    %87 = vector.extract_strided_slice %38 {offsets = [8, 48], sizes = [8, 40], strides = [1, 1]} : vector<16x88xf32> to vector<8x40xf32>
    %c0_50 = arith.constant 0 : index
    %c0_51 = arith.constant 0 : index
    %88 = vector.load %arg12[%c0_50, %c0_51] : memref<8x40xf32, #tpu.memory_space<vmem>>, vector<8x40xf32>
    tpu.vector_store %arg12[%c0_50, %c0_51], %87 {strides = array<i32>} : memref<8x40xf32, #tpu.memory_space<vmem>>, vector<8x40xf32>,
    %89 = vector.extract_strided_slice %24 {offsets = [0, 0], sizes = [8, 32], strides = [1, 1]} : vector<16x32xf32> to vector<8x32xf32>
    %c0_52 = arith.constant 0 : index
    %c0_53 = arith.constant 0 : index
    %90 = vector.load %arg15[%c0_52, %c0_53] : memref<8x32xf32, #tpu.memory_space<vmem>>, vector<8x32xf32>
    tpu.vector_store %arg15[%c0_52, %c0_53], %89 {strides = array<i32>} : memref<8x32xf32, #tpu.memory_space<vmem>>, vector<8x32xf32>,
    %91 = vector.extract_strided_slice %24 {offsets = [8, 0], sizes = [8, 32], strides = [1, 1]} : vector<16x32xf32> to vector<8x32xf32>
    %c0_54 = arith.constant 0 : index
    %c0_55 = arith.constant 0 : index
    %92 = vector.load %arg16[%c0_54, %c0_55] : memref<8x32xf32, #tpu.memory_space<vmem>>, vector<8x32xf32>
    tpu.vector_store %arg16[%c0_54, %c0_55], %91 {strides = array<i32>} : memref<8x32xf32, #tpu.memory_space<vmem>>, vector<8x32xf32>,
    return
  }
}

</mosaic_0001>

<bundles_post_ra>
// kernel: ddea_forward.1
= control target key start
LH: loop header
LB: loop body
LE: loop exit
PB: predicated region body
PF: predicated region fallthrough
CT: control target
= control target key end

     0   :  { %s1743_s0 = inlined_call_operand.vmem [shape: s32[16,1], index: 0, kind: input, shape index: {}]   ;;  %s1744_s1 = inlined_call_operand.vmem [shape: f32[8,88], index: 1, kind: input, shape index: {}]   ;;  %s1745_s2 = inlined_call_operand.vmem [shape: f32[16,32], index: 2, kind: input, shape index: {}]   ;;  %s1746_s3 = inlined_call_operand.vmem [shape: f32[88,64], index: 3, kind: input, shape index: {}]   ;;  %s1747_s4 = inlined_call_operand.vmem [shape: f32[1,64], index: 4, kind: input, shape index: {}]   ;;  %s1748_s5 = inlined_call_operand.vmem [shape: f32[64,64], index: 5, kind: input, shape index: {}]   ;;  %s1749_s6 = inlined_call_operand.vmem [shape: f32[1,64], index: 6, kind: input, shape index: {}]   ;;  %s1750_s7 = inlined_call_operand.vmem [shape: f32[32,64], index: 7, kind: input, shape index: {}]   ;;  %s1751_s8 = inlined_call_operand.vmem [shape: f32[1,64], index: 8, kind: input, shape index: {}]   ;;  %s1752_s9 = inlined_call_operand.vmem [shape: f32[64,88], index: 9, kind: input, shape index: {}]   ;;  %s1753_s10 = inlined_call_operand.vmem [shape: f32[1,88], index: 10, kind: input, shape index: {}]   ;;  %s1754_s11 = inlined_call_operand.hbm [shape: f32[8,48], index: 11, kind: output, shape index: {0}]   ;;  %s1755_s12 = inlined_call_operand.hbm [shape: f32[8,40], index: 12, kind: output, shape index: {1}]   ;;  %s1756_s13 = inlined_call_operand.hbm [shape: f32[8,40], index: 13, kind: output, shape index: {2}]   ;;  %s1757_s14 = inlined_call_operand.hbm [shape: f32[8,48], index: 14, kind: output, shape index: {3}]   ;;  %s1758_s15 = inlined_call_operand.hbm [shape: f32[8,32], index: 15, kind: output, shape index: {4}]   ;;  %s1759_s16 = inlined_call_operand.hbm [shape: f32[8,32], index: 16, kind: output, shape index: {5}]   ;;  %s1760_s17 = inlined_call_operand.vmem [shape: f32[1,2], index: 17, kind: output, shape index: {6}]  }
   0x1   :  { %1762 = sst [smem:[#allocation19_spill]] %s1743_s0 }
   0x2   :  { %1763 = sst [smem:[#allocation20_spill]] %s1744_s1 }
   0x3   :  { %23 = vsyncpa [#allocation3], 0 }
   0x4   :  { %24 = vsyncpa [#allocation6], 0 }
   0x5   :  { %25 = vsyncpa [#allocation9], 0 }
   0x6   :  { %26 = vsyncpa [#allocation12], 0  ;;  %v51_v0 = vld [vmem:[%s1746_s3] sm:$0xff]  ;;  %v52_v1 = vld [vmem:[%s1746_s3 + $0x8] sm:$0xff]  ;;  %v1316_v3 = vmov 0.0|0.0   ;;  %vm1317_vm0 = vmmov 0  }
   0x7   :  { %v53_v2 = vld [vmem:[%s1746_s3 + $0x10] sm:$0xff]  ;;  %1053 = vmatprep.subr.bf16.mxu0 %v1316_v3  ;;  %v1430_v4 = vpack.c.bf16 %v52_v1, %v51_v0  ;;  %v54_v5 = vld [vmem:[%s1746_s3 + $0x18] sm:$0xff]  ;;  %v1318_v6 = vmov 0.0   ;;  %v1319_v7 = vmov 0   ;;  %1068 = vmatprep.subr.bf16.mxu1 %v1316_v3  ;;  %v55_v9 = vld [vmem:[%s1746_s3 + $0x20] sm:$0xff]  ;;  %s1764_s23 = sld [smem:[#allocation19_spill]] }
   0x8   :  { %950 = vmatprep.mubr.msk.f32.mxu0 %vm1317_vm0, %v1318_v6  ;;  %1157 = vset.pattern.permute.xlu0 %v1319_v7  ;;  %v1439_v8 = vpack.c.bf16 %v54_v5, %v53_v2  ;;  %v56_v10 = vld [vmem:[%s1746_s3 + $0x28] sm:$0xff]  ;;  %v144_v12 = vld [vmem:[%s1748_s5] sm:$0xff]  ;;  %v146_v14 = vld [vmem:[%s1748_s5 + $0x10] sm:$0xff] }
   0x9   :  { %1055 = vmatpush3.bf16.msra.mxu0 %v1430_v4  ;;  %969 = vmatprep.mubr.msk.f32.mxu1 %vm1317_vm0, %v1318_v6  ;;  %v145_v13 = vld [vmem:[%s1748_s5 + $0x8] sm:$0xff]  ;;  %v147_v15 = vld [vmem:[%s1748_s5 + $0x18] sm:$0xff]  ;;  %v1471_v18 = vpack.c.bf16 %v56_v10, %v55_v9 }
   0xa   :  { %1056 = vmatprep.subr.bf16.mxu0 %v1316_v3  ;;  %v1468_v17 = vpack.c.bf16 %v145_v13, %v144_v12 }
   0xd   :  { %v235_v11 = vld [vmem:[%s1764_s23] sm:$0xff]  ;;  %v236_v16 = vld [vmem:[%s1764_s23 + $0x8] sm:$0xff]  ;;  %1058 = vmatpush3.bf16.msra.mxu0 %v1439_v8 }
   0xe   :  { %238 = vperm.xlu0 %1157, %v235_v11  }
   0xf   :  { %27 = vsyncpa [#allocation4], 0  ;;  %1059 = vmatprep.subr.bf16.mxu0 %v1316_v3  ;;  %v57_v19 = vld [vmem:[%s1746_s3 + $0x30] sm:$0xff]  ;;  %v58_v20 = vld [vmem:[%s1746_s3 + $0x38] sm:$0xff]  ;;  %1070 = vmatpush3.bf16.msra.mxu1 %v1468_v17  ;;  %v1481_v21 = vpack.c.bf16 %v147_v15, %v146_v14  ;;  %s1765_s20 = sld [smem:[#allocation20_spill]]  ;;  %vm69_vm1 = vcmask 719872   ;;  %v233_v37 = vlaneseq }
  0x10   :  { %1071 = vmatprep.subr.bf16.mxu1 %v1316_v3  ;;  %v148_v22 = vld [vmem:[%s1748_s5 + $0x20] sm:$0xff]  ;;  %v149_v23 = vld [vmem:[%s1748_s5 + $0x28] sm:$0xff]  ;;  %v1491_v24 = vpack.c.bf16 %v58_v20, %v57_v19  ;;  %v1515_v29 = vld [vmem:[%s1746_s3 + $0x50] sm:$0xff]  ;;  %vm159_vm3 = vcmask 523264   ;;  %vm251_vm5 = vcmask 130048   ;;  %s1320_s29 = smov 96  }
  0x11   :  { %1061 = vmatpush3.bf16.msra.mxu0 %v1471_v18  ;;  %v59_v25 = vld [vmem:[%s1746_s3 + $0x40] sm:$0xff]  ;;  %v60_v26 = vld [vmem:[%s1746_s3 + $0x48] sm:$0xff]  ;;  %v1501_v27 = vpack.c.bf16 %v149_v23, %v148_v22  ;;  %v150_v31 = vld [vmem:[%s1748_s5 + $0x30] sm:$0xff]  ;;  %v1537_v39 = vand.u32 127, %v233_v37  ;;  %vm352_vm6 = vcmask 261120   ;;  %vm737_vm7 = vcmask 392192  }
  0x12   :  { %241 = vperm.xlu0 %1157, %v236_v16   ;;  %1062 = vmatprep.subr.bf16.mxu0 %v1316_v3  ;;  %v1505_v28 = vpack.c.bf16 %v60_v26, %v59_v25  ;;  %v151_v32 = vld [vmem:[%s1748_s5 + $0x38] sm:$0xff]  ;;  %v249_v34 = vld [vmem:[%s1745_s2] sm:$0xff]  ;;  %v250_v35 = vld [vmem:[%s1745_s2 + $0x8] sm:$0xff]  ;;  %vm743_vm9 = vcmask 326656   ;;  %s1323_s22 = smov [#allocation5]   ;;  %s1324_s24 = smov [#allocation8]  }
  0x13   :  { %1073 = vmatpush3.bf16.msra.mxu1 %v1481_v21  ;;  %v1528_v33 = vpack.c.bf16 %v151_v32, %v150_v31  ;;  %v1080_v36 = vpack.c.bf16 %v250_v35, %v249_v34  ;;  %v1542_v40 = vld [vmem:[%s1747_s4] ss:$0 sm:$0xff]  ;;  %v342_v49 = vld [vmem:[%s1750_s7 + $0x8] sm:$0xff]  ;;  %v343_v51 = vld [vmem:[%s1750_s7 + $0x10] sm:$0xff]  ;;  %vm532_vm8 = vcmp.lt.s32.totalorder %v1537_v39, 48  ;;  %s769_s23 = sshll.u32 %s1323_s22, 4  ;;  %s770_s23 = int_to_ptr.vmem [resolvable:$true] %s769_s23 }
  0x14   :  { %1074 = vmatprep.subr.bf16.mxu1 %v1316_v3  ;;  %v341_v48 = vld [vmem:[%s1750_s7] sm:$0xff]  ;;  %v344_v52 = vld [vmem:[%s1750_s7 + $0x18] sm:$0xff]  ;;  %v437_v55 = vld [vmem:[%s1752_s9 + $0x8] sm:$0xff]  ;;  %s789_s3 = sshll.u32 %s1324_s24, 4  ;;  %s1162_s25 = scalar_lea.vmem %s770_s23, 128  ;;  %s790_s3 = int_to_ptr.vmem [resolvable:$true] %s789_s3 }
  0x15   :  { %1064 = vmatpush3.bf16.msra.mxu0 %v1491_v24  ;;  %v50_v30 = vld [vmem:[%s1765_s20] sm:$0xff]  ;;  %v1084_v50 = vpack.c.bf16 %v342_v49, %v341_v48  ;;  %v1088_v53 = vpack.c.bf16 %v344_v52, %v343_v51  ;;  %v438_v56 = vld [vmem:[%s1752_s9 + $0x10] sm:$0xff]  ;;  %v439_v58 = vld [vmem:[%s1752_s9 + $0x18] sm:$0xff]  ;;  %p1163_p0 = scmp.ne.s32.totalorder %s770_s23, %s1162_s25  ;;  %p1167_p1 = scmp.lt.s32.totalorder %s770_s23, %s770_s23 }
  0x16   :  { %1065 = vmatprep.subr.bf16.mxu0 %v1316_v3  ;;  %v436_v54 = vld [vmem:[%s1752_s9] sm:$0xff]  ;;  %v1096_v59 = vpack.c.bf16 %v439_v58, %v438_v56  ;;  %v441_v61 = vld [vmem:[%s1752_s9 + $0x28] sm:$0xff]  ;;  %p1168_p2 = scmp.lt.s32.totalorder %s1162_s25, %s1162_s25 }
  0x17   :  { %1076 = vmatpush3.bf16.msra.mxu1 %v1501_v27  ;;  %v1092_v57 = vpack.c.bf16 %v437_v55, %v436_v54  ;;  %v440_v60 = vld [vmem:[%s1752_s9 + $0x20] sm:$0xff] }
  0x18   :  { %1077 = vmatprep.subr.bf16.mxu1 %v1316_v3  ;;  %v1584_v62 = vld [vmem:[%s1749_s6] ss:$0 sm:$0xff]  ;;  %v1100_v63 = vpack.c.bf16 %v441_v61, %v440_v60  ;;  %s1321_s6 = smov 32   ;;  %p1169_p3 = por %p1168_p2, %p1167_p1 }
  0x19   :  { %1067 = vmatpush3.bf16.msra.mxu0 %v1505_v28  ;;  %v858_v15 = vld [vmem:[%s1751_s8] ss:$0 sm:$0xff] }
  0x1a   :  { %948 = vmatprep.subr.mxu0 %v1318_v6  ;;  %p1170_p4 = pnand %p1169_p3, %p1163_p0 }
  0x1b   :  { %1079 = vmatpush3.bf16.msra.mxu1 %v1528_v33 }
  0x1c   :  { %1081 = vmatprep.subr.bf16.mxu1 %v1080_v36 }
  0x1d   :  { %949 = vmatpush3.msra.mxu0 %v1515_v29 }
  0x1e   :  { %951 = vmatmul.mubr.msk.f32.vlgmr.msra.gmra.mrb[0].mxu0 %vm69_vm1, %v50_v30  ;;  %1093 = vmatprep.subr.bf16.mxu0 %v1092_v57 }
  0x1f   :  { %1095 = vmatpush3.bf16.msra.mxu0 %v1092_v57 }
  0x20   :  { %1097 = vmatprep.subr.bf16.mxu0 %v1096_v59 }
  0x23   :  { %1099 = vmatpush3.bf16.msra.mxu0 %v1096_v59 }
  0x24   :  { %1101 = vmatprep.subr.bf16.mxu0 %v1100_v63 }
  0x27   :  { %1103 = vmatpush3.bf16.msra.mxu0 %v1100_v63 }
  0x8d   :  { %v239_v38 = vpop.permute.xlu0 %238 }
  0x8e   :  { %vm243_vm2 = vcmp.eq.s32.totalorder %v1537_v39, %v239_v38 }
  0x8f   :  { %v854_v46 = vsel %vm243_vm2, 1.0, %v1318_v6 }
  0x91   :  { %v242_v42 = vpop.permute.xlu0 %241 }
  0x92   :  { %vm244_vm4 = vcmp.eq.s32.totalorder %v1537_v39, %v242_v42 }
  0x93   :  { %v855_v47 = vsel %vm244_vm4, 1.0, %v1318_v6 }
  0xf1   :  { %v139_v41 = vpop.f32.mrb[0].mxu0 }
  0xf2   :  { %v140_v43 = vadd.f32 %v1542_v40, %v139_v41  ;;  %v952_v44 = vpop.f32.mrb[1].mxu0 }
  0xf4   :  { %v143_v45 = vmax.f32 %v140_v43, 0.0 }
  0xf6   :  { %970 = vmatmul.mubr.msk.f32.vlgmr.msra.gmra.mrb[0].mxu1 %vm159_vm3, %v143_v45 }
  0xf7   :  { %1083 = vmatpush3.bf16.msra.mxu1 %v1080_v36  ;;  %976 = vmatprep.mubr.msk.f32.mxu1 %vm251_vm5, %v854_v46 }
  0xf8   :  { %1085 = vmatprep.subr.bf16.mxu1 %v1084_v50 }
  0xfa   :  { %977 = vmatmul.mubr.msk.f32.vlgmr.msra.gmra.mrb[2].mxu1 %vm251_vm5, %v855_v47 }
  0xfb   :  { %1087 = vmatpush3.bf16.msra.mxu1 %v1084_v50 }
  0xfc   :  { %1089 = vmatprep.subr.bf16.mxu1 %v1088_v53 }
  0xff   :  { %1091 = vmatpush3.bf16.msra.mxu1 %v1088_v53 }
 0x100   :  { %1108 = vmatprep.subr.bf16.mxu1 %v1316_v3 }
 0x1c9   :  { %v229_v0 = vpop.f32.mrb[0].mxu1 }
 0x1ca   :  { %v230_v1 = vadd.f32 %v1584_v62, %v229_v0  ;;  %v971_v2 = vpop.f32.mrb[1].mxu1 }
 0x1cc   :  { %334 = vrot.lane.b32.xlu1 %v230_v1, %s1320_s29 }
 0x1cd   :  { %v1588_v5 = vpop.f32.mrb[2].mxu1 }
 0x1ce   :  { %v324_v7 = vpop.f32.mrb[3].mxu1 }
 0x1cf   :  { %v1590_v9 = vadd.f32 %v324_v7, %v230_v1 }
 0x1d0   :  { %683 = vrot.lane.b32.xlu1 %v324_v7, %s1321_s6 }
 0x1d1   :  { %v339_v10 = vmax.f32 %v1590_v9, 0.0  ;;  %751 = vst.msk [vmem:[#allocation10] sm:$0xff] %vm352_vm6, %v1590_v9 }
 0x1d3   :  { %987 = vmatprep.mubr.msk.f32.mxu1 %vm352_vm6, %v339_v10 }
 0x23e   :  { %v335_v11 = vpop.permute.xlu1 %334 }
 0x23f   :  { %v1599_v12 = vadd.f32 %v1588_v5, %v335_v11 }
 0x241   :  { %v340_v13 = vmax.f32 %v1599_v12, 0.0  ;;  %752 = vst.msk [vmem:[#allocation11] sm:$0xff] %vm352_vm6, %v1599_v12 }
 0x243   :  { %988 = vmatmul.mubr.msk.f32.vlgmr.msra.gmra.mrb[4].mxu1 %vm352_vm6, %v340_v13 }
 0x244   :  { %1110 = vmatpush3.bf16.msra.mxu1 %v1430_v4  ;;  %1031 = vmatprep.mubr.msk.f32.mxu1 %vm1317_vm0, %v1318_v6  ;;  %v442_v4 = vld [vmem:[%s1752_s9 + $0x30] sm:$0xff] }
 0x245   :  { %1111 = vmatprep.subr.bf16.mxu1 %v1316_v3 }
 0x248   :  { %1113 = vmatpush3.bf16.msra.mxu1 %v1439_v8  ;;  %v443_v8 = vld [vmem:[%s1752_s9 + $0x38] sm:$0xff] }
 0x249   :  { %1114 = vmatprep.subr.bf16.mxu1 %v1316_v3  ;;  %v1104_v14 = vpack.c.bf16 %v443_v8, %v442_v4 }
 0x24b   :  { %1105 = vmatprep.subr.bf16.mxu0 %v1104_v14 }
 0x24c   :  { %1116 = vmatpush3.bf16.msra.mxu1 %v1471_v18  ;;  %1107 = vmatpush3.bf16.msra.mxu0 %v1104_v14 }
 0x24d   :  { %1117 = vmatprep.subr.bf16.mxu1 %v1316_v3  ;;  %1123 = vmatprep.subr.bf16.mxu0 %v1316_v3 }
 0x250   :  { %1119 = vmatpush3.bf16.msra.mxu1 %v1491_v24  ;;  %v861_v24 = vld [vmem:[%s1753_s10] ss:$0 sm:$0xff]  ;;  %s1322_s10 = smov 80  }
 0x251   :  { %1120 = vmatprep.subr.bf16.mxu1 %v1316_v3 }
 0x254   :  { %1122 = vmatpush3.bf16.msra.mxu1 %v1505_v28 }
 0x255   :  { %1029 = vmatprep.subr.mxu1 %v1318_v6 }
 0x258   :  { %1030 = vmatpush3.msra.mxu1 %v1515_v29 }
 0x316   :  { %v989_v16 = vpop.f32.mrb[4].mxu1 }
 0x317   :  { %v431_v18 = vadd.f32 %v989_v16, %v858_v15  ;;  %v425_v19 = vpop.f32.mrb[5].mxu1 }
 0x318   :  { %v426_v20 = vadd.f32 %v858_v15, %v425_v19 }
 0x319   :  { %v435_v23 = vmax.f32 %v431_v18, 0.0 }
 0x31a   :  { %v434_v22 = vmax.f32 %v426_v20, 0.0 }
 0x31c   :  { %1006 = vmatprep.mubr.msk.f32.mxu0 %vm159_vm3, %v434_v22 }
 0x31d   :  { %1007 = vmatmul.mubr.msk.f32.vlgmr.msra.gmra.mrb[2].mxu0 %vm159_vm3, %v435_v23 }
 0x31e   :  { %1125 = vmatpush3.bf16.msra.mxu0 %v1468_v17  ;;  %1050 = vmatprep.mubr.msk.f32.mxu0 %vm1317_vm0, %v1318_v6 }
 0x31f   :  { %1126 = vmatprep.subr.bf16.mxu0 %v1316_v3 }
 0x322   :  { %1128 = vmatpush3.bf16.msra.mxu0 %v1481_v21 }
 0x323   :  { %1129 = vmatprep.subr.bf16.mxu0 %v1316_v3 }
 0x326   :  { %1131 = vmatpush3.bf16.msra.mxu0 %v1501_v27 }
 0x327   :  { %1132 = vmatprep.subr.bf16.mxu0 %v1316_v3 }
 0x32a   :  { %1134 = vmatpush3.bf16.msra.mxu0 %v1528_v33  ;;  %v684_v33 = vpop.permute.xlu1 %683 }
 0x3f0   :  { %v1008_v17 = vpop.f32.mrb[2].mxu0 }
 0x3f1   :  { %v529_v25 = vadd.f32 %v1008_v17, %v861_v24  ;;  %v523_v6 = vpop.f32.mrb[3].mxu0 }
 0x3f2   :  { %v524_v26 = vadd.f32 %v861_v24, %v523_v6 }
 0x3f3   :  { %745 = vst.msk [vmem:[#allocation8] sm:$0xff] %vm737_vm7, %v529_v25 }
 0x3f4   :  { %v533_v21 = vsel %vm532_vm8, %v529_v25, %v524_v26  ;;  %738 = vst.msk [vmem:[#allocation2] sm:$0xff] %vm737_vm7, %v524_v26 }
 0x3f5   :  { %1032 = vmatmul.mubr.msk.f32.vlgmr.msra.gmra.mrb[6].mxu1 %vm69_vm1, %v533_v21 }
 0x4c8   :  { %v603_v27 = vpop.f32.mrb[6].mxu1 }
 0x4c9   :  { %v604_v3 = vadd.f32 %v1542_v40, %v603_v27  ;;  %v1033_v28 = vpop.f32.mrb[7].mxu1 }
 0x4cb   :  { %v607_v29 = vmax.f32 %v604_v3, 0.0 }
 0x4cd   :  { %1051 = vmatmul.mubr.msk.f32.vlgmr.msra.gmra.mrb[4].mxu0 %vm159_vm3, %v607_v29 }
 0x5a0   :  { %v677_v30 = vpop.f32.mrb[4].mxu0 }
 0x5a1   :  { %v678_v31 = vadd.f32 %v1584_v62, %v677_v30  ;;  %v1052_v32 = vpop.f32.mrb[5].mxu0 }
 0x5a3   :  { %v681_v34 = vadd.f32 %v1588_v5, %v678_v31  ;;  %v686_v35 = vadd.f32 %v684_v33, %v678_v31 }
 0x5a5   :  { %688 = vrot.lane.b32.xlu0 %v686_v35, %s1320_s29  ;;  %v692_v36 = vsub.f32 %v340_v13, %v681_v34 }
 0x5a7   :  { %v715_v37 = vmul.f32 %v692_v36, %v692_v36 }
 0x5a9   :  { %v716_v38 = vsel %vm352_vm6, %v715_v37, 0.0 }
 0x5c4   :  { %717 = vadd.xlane.f32.xlu0 %v716_v38 }
 0x5da   :  { %747 = vrot.lane.b32.xlu0 %v529_v25, %s1322_s10 }
 0x617   :  { %v689_v39 = vpop.permute.xlu0 %688 }
 0x618   :  { %v691_v40 = vsub.f32 %v339_v10, %v689_v39 }
 0x61a   :  { %v693_v41 = vmul.f32 %v691_v40, %v691_v40 }
 0x61c   :  { %v694_v42 = vsel %vm352_vm6, %v693_v41, 0.0 }
 0x61d   :  { %695 = vadd.xlane.f32.xlu1 %v694_v42 }
 0x62e   :  { %740 = vrot.lane.b32.xlu1 %v524_v26, %s1322_s10 }
 0x651   :  { %v718_v43 = vpop.xlane.xlu0 %717 }
 0x652   :  { %v719_v53 = vrot.slane %v718_v43, 4 }
 0x654   :  { %v720_v54 = vadd.f32 %v719_v53, %v718_v43 }
 0x655   :  { %v748_v44 = vpop.permute.xlu0 %747 }
 0x656   :  { %750 = vst.msk [vmem:[#allocation5] sm:$0xff] %vm743_vm9, %v748_v44  ;;  %v721_v56 = vrot.slane %v720_v54, 2 }
 0x6aa   :  { %v696_v45 = vpop.xlane.xlu1 %695 }
 0x6ab   :  { %v697_v46 = vrot.slane %v696_v45, 4 }
 0x6ad   :  { %v698_v47 = vadd.f32 %v697_v46, %v696_v45 }
 0x6ae   :  { %v741_v48 = vpop.permute.xlu1 %740 }
 0x6af   :  { %v699_v49 = vrot.slane %v698_v47, 2  ;;  %744 = vst.msk [vmem:[#allocation7] sm:$0xff] %vm743_vm9, %v741_v48 }
 0x6b1   :  { %v700_v50 = vadd.f32 %v699_v49, %v698_v47 }
 0x6b3   :  { %v701_v51 = vrot.slane %v700_v50, 1 }
 0x6b5   :  { %v702_v52 = vadd.f32 %v701_v51, %v700_v50 }
 0x6b7   :  { %1135 = vpush %v702_v52 }
 0x6e8   :  { %s1136_s21 = spop %1135 }
 0x6e9   :  { %v1653_v55 = vstv %s1136_s21 }
 0x6ea   :  { %1158 = vrsqrt.f32 %v1653_v55 }
 0x6eb   :  { %1173 = shalt.err (!%p1170_p4)
}
 0x6ec   :  { %s1174_s27 = scalar_lea.hbm %s1755_s12, 128 }
 0x6ed   :  { %p1175_p5 = scmp.ne.s32.totalorder %s1755_s12, %s1174_s27  ;;  %p1178_p6 = scmp.lt.u32.totalorder %s1174_s27, %s1755_s12 }
 0x6ef   :  { %p1180_p7 = pnand %p1178_p6, %p1175_p5 }
 0x6f1   :  { %1183 = shalt.err (!%p1180_p7)
}
 0x6f2   :  { %772 = dma.vmem_to_hbm [thread:$0]  %s770_s23, 128, %s1755_s12, [#allocation6]  }
 0x6f3   :  { %s1184_s0 = scalar_lea.vmem %s790_s3, 128  ;;  %p1189_p9 = scmp.lt.s32.totalorder %s790_s3, %s790_s3 }
 0x6f4   :  { %p1185_p8 = scmp.ne.s32.totalorder %s790_s3, %s1184_s0  ;;  %p1190_p10 = scmp.lt.s32.totalorder %s1184_s0, %s1184_s0 }
 0x6f6   :  { %p1191_p11 = por %p1190_p10, %p1189_p9 }
 0x6f8   :  { %p1192_p12 = pnand %p1191_p11, %p1185_p8 }
 0x6fa   :  { %1195 = shalt.err (!%p1192_p12)
}
 0x6fb   :  { %s1196_s19 = scalar_lea.hbm %s1757_s14, 128 }
 0x6fc   :  { %p1197_p13 = scmp.ne.s32.totalorder %s1757_s14, %s1196_s19  ;;  %p1200_p0 = scmp.lt.u32.totalorder %s1196_s19, %s1757_s14 }
 0x6fe   :  { %p1202_p1 = pnand %p1200_p0, %p1197_p13 }
 0x700   :  { %1205 = shalt.err (!%p1202_p1)
}
 0x701   :  { %792 = dma.vmem_to_hbm [thread:$0]  %s790_s3, 128, %s1757_s14, [#allocation9]   ;;  %v722_v57 = vadd.f32 %v721_v56, %v720_v54 }
 0x702   :  { %s1325_s21 = smov [#allocation2]   ;;  %s1326_s23 = smov [#allocation7]  }
 0x703   :  { %s759_s22 = sshll.u32 %s1325_s21, 4  ;;  %s779_s24 = sshll.u32 %s1326_s23, 4  ;;  %s760_s22 = int_to_ptr.vmem [resolvable:$true] %s759_s22  ;;  %s780_s24 = int_to_ptr.vmem [resolvable:$true] %s779_s24 }
 0x704   :  { %s1206_s25 = scalar_lea.vmem %s760_s22, 128  ;;  %p1211_p3 = scmp.lt.s32.totalorder %s760_s22, %s760_s22 }
 0x705   :  { %p1207_p2 = scmp.ne.s32.totalorder %s760_s22, %s1206_s25  ;;  %p1212_p4 = scmp.lt.s32.totalorder %s1206_s25, %s1206_s25 }
 0x707   :  { %p1213_p5 = por %p1212_p4, %p1211_p3 }
 0x709   :  { %p1214_p6 = pnand %p1213_p5, %p1207_p2 }
 0x70b   :  { %1217 = shalt.err (!%p1214_p6)
}
 0x70c   :  { %s1218_s27 = scalar_lea.hbm %s1754_s11, 128 }
 0x70d   :  { %p1219_p7 = scmp.ne.s32.totalorder %s1754_s11, %s1218_s27  ;;  %p1222_p8 = scmp.lt.u32.totalorder %s1218_s27, %s1754_s11 }
 0x70f   :  { %p1224_p9 = pnand %p1222_p8, %p1219_p7 }
 0x711   :  { %1227 = shalt.err (!%p1224_p9)
}
 0x712   :  { %762 = dma.vmem_to_hbm [thread:$0]  %s760_s22, 128, %s1754_s11, [#allocation3]   ;;  %v1159_v58 = vpop.eup %1158  ;;  %v723_v59 = vrot.slane %v722_v57, 1 }
 0x713   :  { %s1228_s29 = scalar_lea.vmem %s780_s24, 128  ;;  %p1233_p11 = scmp.lt.s32.totalorder %s780_s24, %s780_s24 }
 0x714   :  { %p1229_p10 = scmp.ne.s32.totalorder %s780_s24, %s1228_s29  ;;  %p1234_p12 = scmp.lt.s32.totalorder %s1228_s29, %s1228_s29 }
 0x716   :  { %p1235_p13 = por %p1234_p12, %p1233_p11 }
 0x718   :  { %p1236_p0 = pnand %p1235_p13, %p1229_p10 }
 0x71a   :  { %1239 = shalt.err (!%p1236_p0)
}
 0x71b   :  { %s1240_s30 = scalar_lea.hbm %s1756_s13, 128 }
 0x71c   :  { %p1241_p1 = scmp.ne.s32.totalorder %s1756_s13, %s1240_s30  ;;  %p1244_p2 = scmp.lt.u32.totalorder %s1240_s30, %s1756_s13 }
 0x71e   :  { %p1246_p3 = pnand %p1244_p2, %p1241_p1 }
 0x720   :  { %1249 = shalt.err (!%p1246_p3)
}
 0x721   :  { %782 = dma.vmem_to_hbm [thread:$0]  %s780_s24, 128, %s1756_s13, [#allocation6]   ;;  %v706_v60 = vmul.f32 %v1159_v58, %v1653_v55  ;;  %vm707_vm10 = vcmp.eq.f32.partialorder %v1653_v55, inf  ;;  %v710_v61 = vand.u32 2147483648, %v1653_v55  ;;  %vm709_vm11 = vcmp.eq.f32.partialorder %v1653_v55, 0.0 }
 0x722   :  { %s1327_s9 = smov [#allocation10]   ;;  %s1328_s10 = smov [#allocation11]   ;;  %v724_v0 = vadd.f32 %v723_v59, %v722_v57 }
 0x723   :  { %s799_s12 = sshll.u32 %s1327_s9, 4  ;;  %s809_s21 = sshll.u32 %s1328_s10, 4  ;;  %v708_v62 = vsel %vm707_vm10, %v1653_v55, %v706_v60  ;;  %s800_s12 = int_to_ptr.vmem [resolvable:$true] %s799_s12  ;;  %s1709_s21 = int_to_ptr.vmem [resolvable:$true] %s809_s21 }
 0x724   :  { %v711_v63 = vsel %vm709_vm11, %v710_v61, %v708_v62  ;;  %s1250_s13 = scalar_lea.vmem %s800_s12, 128  ;;  %p1255_p5 = scmp.lt.s32.totalorder %s800_s12, %s800_s12 }
 0x725   :  { %p1251_p4 = scmp.ne.s32.totalorder %s800_s12, %s1250_s13  ;;  %p1256_p6 = scmp.lt.s32.totalorder %s1250_s13, %s1250_s13 }
 0x727   :  { %p1257_p7 = por %p1256_p6, %p1255_p5 }
 0x729   :  { %p1258_p8 = pnand %p1257_p7, %p1251_p4 }
 0x72b   :  { %1261 = shalt.err (!%p1258_p8)
}
 0x72c   :  { %s1262_s24 = scalar_lea.hbm %s1758_s15, 128 }
 0x72d   :  { %p1263_p9 = scmp.ne.s32.totalorder %s1758_s15, %s1262_s24  ;;  %p1266_p10 = scmp.lt.u32.totalorder %s1262_s24, %s1758_s15 }
 0x72f   :  { %p1268_p11 = pnand %p1266_p10, %p1263_p9 }
 0x731   :  { %1271 = shalt.err (!%p1268_p11)
}
 0x732   :  { %802 = dma.vmem_to_hbm [thread:$0]  %s800_s12, 128, %s1758_s15, [#allocation9]   ;;  %1137 = vpush %v711_v63 }
 0x733   :  { %s1272_s3 = scalar_lea.vmem %s1709_s21, 128  ;;  %p1277_p13 = scmp.lt.s32.totalorder %s1709_s21, %s1709_s21 }
 0x734   :  { %p1273_p12 = scmp.ne.s32.totalorder %s1709_s21, %s1272_s3  ;;  %p1278_p0 = scmp.lt.s32.totalorder %s1272_s3, %s1272_s3 }
 0x736   :  { %p1279_p1 = por %p1278_p0, %p1277_p13 }
 0x738   :  { %p1280_p2 = pnand %p1279_p1, %p1273_p12 }
 0x73a   :  { %1283 = shalt.err (!%p1280_p2)
}
 0x73b   :  { %s1284_s4 = scalar_lea.hbm %s1759_s16, 128 }
 0x73c   :  { %p1285_p3 = scmp.ne.s32.totalorder %s1759_s16, %s1284_s4  ;;  %p1288_p4 = scmp.lt.u32.totalorder %s1284_s4, %s1759_s16 }
 0x73e   :  { %p1290_p5 = pnand %p1288_p4, %p1285_p3 }
 0x740   :  { %1293 = shalt.err (!%p1290_p5)
}
 0x741   :  { %812 = dma.vmem_to_hbm [thread:$0]  %s1709_s21, 128, %s1759_s16, [#allocation12]   ;;  %1139 = vpush %v724_v0 }
 0x742   :  { %s819_s8 = sshll.u32 %s1760_s17, 4  ;;  %s820_s8 = int_to_ptr.vmem [resolvable:$true] %s819_s8 }
 0x743   :  { %s1294_s9 = scalar_lea.vmem %s820_s8, 16  ;;  %p1299_p7 = scmp.lt.s32.totalorder %s820_s8, %s820_s8 }
 0x744   :  { %p1295_p6 = scmp.ne.s32.totalorder %s820_s8, %s1294_s9  ;;  %p1300_p8 = scmp.lt.s32.totalorder %s1294_s9, %s1294_s9 }
 0x746   :  { %p1301_p9 = por %p1300_p8, %p1299_p7 }
 0x748   :  { %p1302_p10 = pnand %p1301_p9, %p1295_p6 }
 0x763   :  { %s1138_s19 = spop %1137 }
 0x764   :  { %714 = sst [smem:[#allocation13]] %s1138_s19 }
 0x772   :  { %s1140_s1 = spop %1139 }
 0x773   :  { %v726_v1 = vstv %s1140_s1 }
 0x774   :  { %1160 = vrsqrt.f32 %v726_v1  ;;  %vm729_vm12 = vcmp.eq.f32.partialorder %v726_v1, inf  ;;  %v732_v7 = vand.u32 2147483648, %v726_v1  ;;  %vm731_vm13 = vcmp.eq.f32.partialorder %v726_v1, 0.0 }
 0x77e   :  { %v1161_v2 = vpop.eup %1160 }
 0x77f   :  { %v728_v5 = vmul.f32 %v1161_v2, %v726_v1 }
 0x781   :  { %v730_v9 = vsel %vm729_vm12, %v726_v1, %v728_v5 }
 0x782   :  { %v733_v10 = vsel %vm731_vm13, %v732_v7, %v730_v9 }
 0x783   :  { %1141 = vpush %v733_v10 }
 0x7b4   :  { %s1142_s16 = spop %1141 }
 0x7b5   :  { %736 = sst [smem:[#allocation13 + $0x1]] %s1142_s16 }
 0x7b6   :  { %1305 = shalt.err (!%p1302_p10)
}
 0x7b7   :  { %s1329_s12 = smov [#allocation13]  }
 0x7b8   :  { %822 = dma.smem_to_vmem %s1329_s12, 16, %s820_s8, [#allocation4]  }
 0x7b9   :  { %1306 = dma.done.wait [#allocation3], 128  }
 0x7ba   :  { %1307 = vsyncadd [#allocation3], 4294967168 }
 0x7bb   :  { %1308 = dma.done.wait [#allocation6], 256  }
 0x7bc   :  { %1309 = vsyncadd [#allocation6], 4294967040 }
 0x7bd   :  { %1310 = dma.done.wait [#allocation9], 256  }
 0x7be   :  { %1311 = vsyncadd [#allocation9], 4294967040 }
 0x7bf   :  { %1312 = dma.done.wait [#allocation12], 128  }
 0x7c0   :  { %1313 = vsyncadd [#allocation12], 4294967168 }
 0x7c1   :  { %1314 = dma.done.wait [#allocation4], 16  }
 0x7c2   :  { %1315 = vsyncadd [#allocation4], 4294967280 }
 0x7c3   :  { %844 = sfence }
 0x7c4   :  { %845 = vsyncpa [#allocation3], 1 }
 0x7c5   :  { %846 = vsyncpa [#allocation6], 1 }
 0x7c6   :  { %847 = vsyncpa [#allocation9], 1 }
 0x7c7   :  { %848 = vsyncpa [#allocation12], 1 }
 0x7c8   :  { %849 = vsyncpa [#allocation4], 1 }

</bundles_post_ra>
